<compile_context>
chip_gen: v7x
topology: tpu7x:2x2x1
jax: 0.10.0
libtpu: 0.0.40
codegen_flags: <defaults>
</compile_context>

<pallas_src>
import functools
import math

import jax
import jax.numpy as jnp
import numpy as np
from jax import lax
from jax.experimental import pallas as pl
from jax.experimental.pallas import tpu as pltpu

LRELU_SLOPE = 0.2


def _cdiv(a, b):
    return -(-a // b)


def _round_up(a, b):
    return _cdiv(a, b) * b


def _tpu_defaults():
    """Per-generation performance knobs (never affect correctness)."""
    kind = ""
    try:
        kind = str(getattr(jax.devices()[0], "device_kind", "")).lower()
    except Exception:
        pass
    if "v7" in kind:            # 64 MiB VMEM / TC, 256-wide MXU, 2 TensorCores
        return dict(mxu=256, budget=28 << 20, limit=40 << 20)
    if "v6" in kind:            # 128 MiB VMEM, 256-wide MXU
        return dict(mxu=256, budget=64 << 20, limit=96 << 20)
    if "v5 lite" in kind or "v5lite" in kind or "v5e" in kind:
        return dict(mxu=128, budget=64 << 20, limit=96 << 20)   # 128-wide MXU
    # v2/v3/v4/v5p/unknown: stay under the default scoped-VMEM limit.
    return dict(mxu=128, budget=12 << 20, limit=None)


def _conv_lrelu_kernel(xm_ref, xh_ref, w_ref, b_ref, o_ref, band_ref, *scratch,
                       K, Wp, ST, sub, fold):
    """One (batch, cout-tile, row-tile) grid step.

    xm_ref:   (1, TM, Cin)   main window of the flattened padded input
    xh_ref:   (1, BH, Cin)   halo rows immediately after the main window
    w_ref:    (K, K*Cin, TC) [fold] or (K, K, Cin, TC) conv weights (gains folded)
    b_ref:    (1, TC)        float32 bias (gains folded)
    o_ref:    (1, TM, TC)    output tile (flattened spatial rows)
    band_ref: (TM+BH, Cin)   VMEM scratch: stitched main + halo band
    scratch:  (ST, K*Cin)    VMEM wide-band scratch, only when fold=True
    """
    TM = o_ref.shape[1]
    TC = o_ref.shape[2]
    Cin = band_ref.shape[1]
    wide_ref = scratch[0] if fold else None

    # Stitch main + halo rows into one contiguous band so every conv tap below
    # is a plain row-shifted 2-D window feeding the MXU.
    # TODO(synk): a manual overlapping-window DMA (pl.ANY + make_async_copy)
    # would remove this single per-step VMEM copy entirely.
    band_ref[:TM, :] = xm_ref[0]
    band_ref[TM:, :] = xh_ref[0]

    bias = b_ref[...]                               # (1, TC) float32
    n_sub = _cdiv(TM, ST)

    def subtile(i, carry):
        # Clamp the last subtile so ST need not divide TM (overlap rows are
        # recomputed with identical values).  s0 stays a multiple of `sub`.
        s0 = pl.multiple_of(jnp.minimum(i * ST, TM - ST), sub)
        acc = jnp.zeros((ST, TC), jnp.float32)      # vreg-resident accumulator
        for kh in range(K):
            if fold:
                # Fold width taps into the contraction dim:
                #   wide[:, kw*Cin:(kw+1)*Cin] = band[s0 + kh*Wp + kw :: +ST]
                for kw in range(K):
                    wide_ref[:, kw * Cin:(kw + 1) * Cin] = (
                        band_ref[pl.ds(s0 + kh * Wp + kw, ST), :])
                acc = acc + jnp.dot(wide_ref[...], w_ref[kh],
                                    preferred_element_type=jnp.float32)
            else:
                for kw in range(K):
                    acc = acc + jnp.dot(
                        band_ref[pl.ds(s0 + kh * Wp + kw, ST), :], w_ref[kh, kw],
                        preferred_element_type=jnp.float32)
        y = acc + bias
        y = jnp.where(y >= 0.0, y, LRELU_SLOPE * y)  # lrelu (def_gain pre-folded)
        o_ref[0, pl.ds(s0, ST), :] = y.astype(o_ref.dtype)
        return carry

    lax.fori_loop(0, n_sub, subtile, 0)


def conv2d_sg2_forward(x_nchw, weight_oihw, bias, *, lr_multiplier=1.0, gain=1.0,
                       compute_dtype=jnp.bfloat16, fold_taps=None,
                       row_tile_multiple=None, vmem_budget_bytes=None,
                       vmem_limit_bytes=None):
    """Forward of sg2 Conv2d (up=down=1, act='lrelu', no clamp/norm/modulation)."""
    N, Cin, H, W = x_nchw.shape
    Cout, Cin_w, K, K2 = weight_oihw.shape
    assert Cin == Cin_w and K == K2 and K % 2 == 1
    pad = K // 2

    hw = _tpu_defaults()
    budget = int(vmem_budget_bytes) if vmem_budget_bytes is not None else hw["budget"]
    limit = vmem_limit_bytes if vmem_limit_bytes is not None else hw["limit"]

    out_dtype = x_nchw.dtype
    cdt = jnp.dtype(compute_dtype)
    dbytes = cdt.itemsize
    obytes = jnp.dtype(out_dtype).itemsize
    sub = max(8, 32 // dbytes)                     # sublane tile: 8 f32 / 16 bf16

    # Padded width; add a few extra (cropped) columns when that makes the
    # per-kh flat-row tap offsets sublane-aligned at <= 12.5% waste.
    Wp = W + 2 * pad
    Wp_al = _round_up(Wp, sub)
    if (Wp_al - Wp) * 8 <= Wp:
        Wp = Wp_al
    Hp = H + 2 * pad

    act_gain = math.sqrt(2.0) * gain               # lrelu def_gain * gain
    w_scale = (lr_multiplier / math.sqrt(Cin * K * K)) * act_gain
    b_scale = lr_multiplier * act_gain

    # ---- Cout padding: lane-dense stores / full MXU width --------------------
    Cout_pad = _round_up(Cout, 128)
    TC = 256 if (hw["mxu"] >= 256 and Cout_pad % 256 == 0) else 128
    n_ct = Cout_pad // TC

    # Fold width taps into the contraction when the MXU depth would be starved.
    fold = (Cin < 256 and K > 1) if fold_taps is None else bool(fold_taps)

    # ---- row tiling -----------------------------------------------------------
    halo = (K - 1) * Wp + (K - 1)                  # flat rows a tile's conv reaches into
    BH = _round_up(max(halo, sub), sub)
    total_q = H * Wp                               # useful flattened output rows / image
    m_cap = _cdiv(total_q, BH)
    ST_target = max(sub, _round_up(24576 // TC, sub))   # acc ~ 96 KiB of vregs
    if row_tile_multiple is not None:
        m = max(1, min(int(row_tile_multiple), m_cap))
    else:
        fixed = (3 * BH * Cin + 2 * K * K * Cin * TC) * dbytes   # halo bufs + band halo + weights(x2)
        fixed += 4 * TC * 4 + ST_target * K * Cin * dbytes       # bias bufs + wide scratch
        fixed += 1 << 20                                         # compiler headroom
        per_row = 3 * Cin * dbytes + 2 * TC * obytes             # xm(x2) + band + out(x2, out dtype)
        tm_cap = max(BH, (budget - fixed) // max(per_row, 1))
        m = max(1, min(tm_cap // BH, m_cap))
    # Keep >= 2 grid iterations available for dual-TensorCore parts.
    if N * n_ct == 1 and m_cap >= 2:
        m = min(m, _cdiv(m_cap, 2))
    TM = m * BH
    m_h = TM // BH
    n_rt = _cdiv(total_q, TM)
    R_out = n_rt * TM
    R_in = R_out + BH
    ST = min(TM, ST_target)

    # ---- host-side layout glue (cheap XLA ops) --------------------------------
    # TODO(synk): up/down resampling (upfirdn2d), InstanceNorm, conv_clamp and the
    # w/s style-modulation branches are not ported; keeping the surrounding model
    # NHWC end-to-end would also remove these two transposes.
    x_nhwc = jnp.transpose(x_nchw, (0, 2, 3, 1)).astype(cdt)
    x_pad = jnp.pad(x_nhwc, ((0, 0), (pad, pad), (pad, Wp - W - pad), (0, 0)))
    x_flat = x_pad.reshape(N, Hp * Wp, Cin)
    x_flat = jnp.pad(x_flat, ((0, 0), (0, R_in - Hp * Wp), (0, 0)))

    w_kkio = jnp.transpose(weight_oihw, (2, 3, 1, 0)).astype(jnp.float32) * w_scale
    w_kkio = jnp.pad(w_kkio, ((0, 0), (0, 0), (0, 0), (0, Cout_pad - Cout))).astype(cdt)
    w_arr = w_kkio.reshape(K, K * Cin, Cout_pad) if fold else w_kkio
    b_arr = jnp.pad(bias.astype(jnp.float32) * b_scale,
                    (0, Cout_pad - Cout)).reshape(1, Cout_pad)

    kernel = functools.partial(_conv_lrelu_kernel, K=K, Wp=Wp, ST=ST, sub=sub, fold=fold)
    w_block = (K, K * Cin, TC) if fold else (K, K, Cin, TC)

    # Grid order: put the Cout-tile axis innermost when weights are cheaper to
    # re-stream than the activation window (avoids re-reading the image n_ct x).
    c_inner = (n_ct > 1) and (K * K * TC <= TM)
    if c_inner:
        grid = (N, n_rt, n_ct)
        xm_map = lambda n, r, c: (n, r, 0)
        xh_map = lambda n, r, c: (n, (r + 1) * m_h, 0)
        w_map = (lambda n, r, c: (0, 0, c)) if fold else (lambda n, r, c: (0, 0, 0, c))
        b_map = lambda n, r, c: (0, c)
        o_map = lambda n, r, c: (n, r, c)
    else:
        grid = (N, n_ct, n_rt)
        xm_map = lambda n, c, r: (n, r, 0)
        xh_map = lambda n, c, r: (n, (r + 1) * m_h, 0)
        w_map = (lambda n, c, r: (0, 0, c)) if fold else (lambda n, c, r: (0, 0, 0, c))
        b_map = lambda n, c, r: (0, c)
        o_map = lambda n, c, r: (n, r, c)

    scratch = [pltpu.VMEM((TM + BH, Cin), cdt)]
    if fold:
        scratch.append(pltpu.VMEM((ST, K * Cin), cdt))

    cost = pl.CostEstimate(
        flops=2 * N * H * W * K * K * Cin * Cout,
        transcendentals=0,
        bytes_accessed=int(x_flat.size * dbytes + w_kkio.size * dbytes
                           + N * R_out * Cout_pad * obytes),
    )
    cp_kwargs = dict(dimension_semantics=("parallel", "parallel", "parallel"))
    if limit is not None:
        cp_kwargs["vmem_limit_bytes"] = int(limit)

    out_flat = pl.pallas_call(
        kernel,
        out_shape=jax.ShapeDtypeStruct((N, R_out, Cout_pad), out_dtype),
        grid=grid,
        in_specs=[
            pl.BlockSpec((1, TM, Cin), xm_map),      # main flat-row window
            pl.BlockSpec((1, BH, Cin), xh_map),      # halo rows
            pl.BlockSpec(w_block, w_map),            # weights (gains folded)
            pl.BlockSpec((1, TC), b_map),            # bias  (gains folded)
        ],
        out_specs=pl.BlockSpec((1, TM, TC), o_map),
        scratch_shapes=scratch,
        compiler_params=pltpu.CompilerParams(**cp_kwargs),
        cost_estimate=cost,
    )(x_flat, x_flat, w_arr, b_arr)

    # Crop padded-width "garbage" columns, overshoot rows and padded Cout; NCHW.
    out = out_flat[:, :H * Wp, :].reshape(N, H, Wp, Cout_pad)[:, :, :W, :Cout]
    return jnp.transpose(out, (0, 3, 1, 2))


def _reference_forward(x_nchw, weight_oihw, bias, *, lr_multiplier=1.0, gain=1.0):
    """Pure-JAX reference of the same forward (for the correctness check)."""
    Cout, Cin, K, _ = weight_oihw.shape
    wg = lr_multiplier / math.sqrt(Cin * K * K)
    y = lax.conv_general_dilated(
        x_nchw, weight_oihw * wg, window_strides=(1, 1),
        padding=((K // 2, K // 2), (K // 2, K // 2)),
        dimension_numbers=("NCHW", "OIHW", "NCHW"),
        precision=lax.Precision.HIGHEST)
    y = y + (bias * lr_multiplier)[None, :, None, None]
    return jnp.where(y >= 0.0, y, LRELU_SLOPE * y) * (math.sqrt(2.0) * gain)


if __name__ == "__main__":
    # Deterministic synthetic parameters / inputs (matches module __init__ shapes).
    in_channels, out_channels, K = 4, 8, 3
    N, H, W = 2, 16, 16

    key = jax.random.PRNGKey(0)
    kx, kw = jax.random.split(key)
    x = jax.random.normal(kx, (N, in_channels, H, W), dtype=jnp.float32)
    weight = jax.random.normal(kw, (out_channels, in_channels, K, K),
                               dtype=jnp.float32)            # torch.randn init
    bias = jnp.zeros((out_channels,), dtype=jnp.float32)      # bias_init = 0

    ref = jax.block_until_ready(_reference_forward(x, weight, bias))

    # f32 compute, direct (unfolded) tap path, forced multi-row-tile grid.
    out_f32 = jax.block_until_ready(conv2d_sg2_forward(
        x, weight, bias, compute_dtype=jnp.float32, fold_taps=False,
        row_tile_multiple=2))
    np.testing.assert_allclose(np.asarray(out_f32), np.asarray(ref),
                               rtol=1e-4, atol=1e-4)

    # f32 compute with the folded-width-tap path (tight tolerance on the fold).
    out_f32_fold = jax.block_until_ready(conv2d_sg2_forward(
        x, weight, bias, compute_dtype=jnp.float32, fold_taps=True))
    np.testing.assert_allclose(np.asarray(out_f32_fold), np.asarray(ref),
                               rtol=1e-4, atol=1e-4)

    # Default path: bf16 compute (f32 accumulation), folded taps, padded Cout.
    out_bf16 = jax.block_until_ready(conv2d_sg2_forward(x, weight, bias))
    np.testing.assert_allclose(np.asarray(out_bf16), np.asarray(ref),
                               rtol=3e-2, atol=5e-2)

    # bf16 + several row tiles (exercises the halo stitch across tiles).
    out_bf16_t = jax.block_until_ready(
        conv2d_sg2_forward(x, weight, bias, row_tile_multiple=2))
    np.testing.assert_allclose(np.asarray(out_bf16_t), np.asarray(ref),
                               rtol=3e-2, atol=5e-2)

    print("KERNEL_OK")
</pallas_src>

<mosaic_0001>
module attributes {stable_mosaic.version = 11 : i64} {
  func.func @_conv_lrelu_kernel(%arg0: i32, %arg1: i32, %arg2: i32, %arg3: memref<1x80x4xf32, #tpu.memory_space<vmem>>, %arg4: memref<1x40x4xf32, #tpu.memory_space<vmem>>, %arg5: memref<3x3x4x128xf32, #tpu.memory_space<vmem>>, %arg6: memref<1x128xf32, #tpu.memory_space<vmem>>, %arg7: memref<1x80x128xf32, #tpu.memory_space<vmem>>, %arg8: memref<120x4xf32, #tpu.memory_space<vmem>>) attributes {dimension_semantics = [#tpu.dimension_semantics<parallel>, #tpu.dimension_semantics<parallel>, #tpu.dimension_semantics<parallel>], iteration_bounds = array<i64: 2, 1, 4>, scalar_prefetch = 0 : i64, scratch_operands = 1 : i64, tpu.core_type = #tpu.core_type<tc>, window_params = [{transform_indices = @transform_0, window_bounds = array<i64: 1, 80, 4>}, {transform_indices = @transform_1, window_bounds = array<i64: 1, 40, 4>}, {transform_indices = @transform_2, window_bounds = array<i64: 3, 3, 4, 128>}, {transform_indices = @transform_3, window_bounds = array<i64: 1, 128>}, {transform_indices = @transform_4, window_bounds = array<i64: 1, 80, 128>}]} {
    %c0 = arith.constant 0 : index
    %c0_0 = arith.constant 0 : index
    %c0_1 = arith.constant 0 : index
    %0 = vector.load %arg3[%c0, %c0_0, %c0_1] : memref<1x80x4xf32, #tpu.memory_space<vmem>>, vector<1x80x4xf32>
    %1 = vector.shape_cast %0 : vector<1x80x4xf32> to vector<80x4xf32>
    %c0_2 = arith.constant 0 : index
    %c0_3 = arith.constant 0 : index
    %2 = vector.load %arg8[%c0_2, %c0_3] : memref<120x4xf32, #tpu.memory_space<vmem>>, vector<80x4xf32>
    tpu.vector_store %arg8[%c0_2, %c0_3], %1 {strides = array<i32>} : memref<120x4xf32, #tpu.memory_space<vmem>>, vector<80x4xf32>,
    %c0_4 = arith.constant 0 : index
    %c0_5 = arith.constant 0 : index
    %c0_6 = arith.constant 0 : index
    %3 = vector.load %arg4[%c0_4, %c0_5, %c0_6] : memref<1x40x4xf32, #tpu.memory_space<vmem>>, vector<1x40x4xf32>
    %4 = vector.shape_cast %3 : vector<1x40x4xf32> to vector<40x4xf32>
    %c80 = arith.constant 80 : index
    %c0_7 = arith.constant 0 : index
    %5 = vector.load %arg8[%c80, %c0_7] : memref<120x4xf32, #tpu.memory_space<vmem>>, vector<40x4xf32>
    tpu.vector_store %arg8[%c80, %c0_7], %4 {strides = array<i32>} : memref<120x4xf32, #tpu.memory_space<vmem>>, vector<40x4xf32>,
    %c0_8 = arith.constant 0 : index
    %c0_9 = arith.constant 0 : index
    %6 = vector.load %arg6[%c0_8, %c0_9] : memref<1x128xf32, #tpu.memory_space<vmem>>, vector<1x128xf32>
    %c0_i32 = arith.constant 0 : i32
    %c80_i32 = arith.constant 80 : i32
    %7 = arith.muli %c0_i32, %c80_i32 : i32
    %c0_i32_10 = arith.constant 0 : i32
    %8 = arith.minsi %7, %c0_i32_10 : i32
    %9 = tpu.assume_multiple %8, 8 : i32
    %cst = arith.constant 0.000000e+00 : f32
    %10 = vector.broadcast %cst : f32 to vector<80x128xf32>
    %c0_i32_11 = arith.constant 0 : i32
    %11 = arith.addi %9, %c0_i32_11 : i32
    %c0_i32_12 = arith.constant 0 : i32
    %12 = arith.addi %11, %c0_i32_12 : i32
    %13 = arith.index_cast %12 : i32 to index
    %c0_13 = arith.constant 0 : index
    %14 = vector.load %arg8[%13, %c0_13] : memref<120x4xf32, #tpu.memory_space<vmem>>, vector<80x4xf32>
    %c0_14 = arith.constant 0 : index
    %c0_15 = arith.constant 0 : index
    %c0_16 = arith.constant 0 : index
    %c0_17 = arith.constant 0 : index
    %15 = vector.load %arg5[%c0_14, %c0_15, %c0_16, %c0_17] : memref<3x3x4x128xf32, #tpu.memory_space<vmem>>, vector<1x1x4x128xf32>
    %16 = vector.shape_cast %15 : vector<1x1x4x128xf32> to vector<4x128xf32>
    %cst_18 = arith.constant dense<0.000000e+00> : vector<80x128xf32>
    %17 = tpu.matmul %14, %16, %cst_18 {dimension_numbers = #tpu.dot_dimension_numbers<[1], [0], [0], [1], [0, 0, 1, 1], [], []>} : vector<80x4xf32>, vector<4x128xf32>, vector<80x128xf32> -> vector<80x128xf32>
    %18 = arith.addf %10, %17 : vector<80x128xf32>
    %c0_i32_19 = arith.constant 0 : i32
    %19 = arith.addi %9, %c0_i32_19 : i32
    %c1_i32 = arith.constant 1 : i32
    %20 = arith.addi %19, %c1_i32 : i32
    %21 = arith.index_cast %20 : i32 to index
    %c0_20 = arith.constant 0 : index
    %22 = vector.load %arg8[%21, %c0_20] : memref<120x4xf32, #tpu.memory_space<vmem>>, vector<80x4xf32>
    %c0_21 = arith.constant 0 : index
    %c1 = arith.constant 1 : index
    %c0_22 = arith.constant 0 : index
    %c0_23 = arith.constant 0 : index
    %23 = vector.load %arg5[%c0_21, %c1, %c0_22, %c0_23] : memref<3x3x4x128xf32, #tpu.memory_space<vmem>>, vector<1x1x4x128xf32>
    %24 = vector.shape_cast %23 : vector<1x1x4x128xf32> to vector<4x128xf32>
    %cst_24 = arith.constant dense<0.000000e+00> : vector<80x128xf32>
    %25 = tpu.matmul %22, %24, %cst_24 {dimension_numbers = #tpu.dot_dimension_numbers<[1], [0], [0], [1], [0, 0, 1, 1], [], []>} : vector<80x4xf32>, vector<4x128xf32>, vector<80x128xf32> -> vector<80x128xf32>
    %26 = arith.addf %18, %25 : vector<80x128xf32>
    %c0_i32_25 = arith.constant 0 : i32
    %27 = arith.addi %9, %c0_i32_25 : i32
    %c2_i32 = arith.constant 2 : i32
    %28 = arith.addi %27, %c2_i32 : i32
    %29 = arith.index_cast %28 : i32 to index
    %c0_26 = arith.constant 0 : index
    %30 = vector.load %arg8[%29, %c0_26] : memref<120x4xf32, #tpu.memory_space<vmem>>, vector<80x4xf32>
    %c0_27 = arith.constant 0 : index
    %c2 = arith.constant 2 : index
    %c0_28 = arith.constant 0 : index
    %c0_29 = arith.constant 0 : index
    %31 = vector.load %arg5[%c0_27, %c2, %c0_28, %c0_29] : memref<3x3x4x128xf32, #tpu.memory_space<vmem>>, vector<1x1x4x128xf32>
    %32 = vector.shape_cast %31 : vector<1x1x4x128xf32> to vector<4x128xf32>
    %cst_30 = arith.constant dense<0.000000e+00> : vector<80x128xf32>
    %33 = tpu.matmul %30, %32, %cst_30 {dimension_numbers = #tpu.dot_dimension_numbers<[1], [0], [0], [1], [0, 0, 1, 1], [], []>} : vector<80x4xf32>, vector<4x128xf32>, vector<80x128xf32> -> vector<80x128xf32>
    %34 = arith.addf %26, %33 : vector<80x128xf32>
    %c18_i32 = arith.constant 18 : i32
    %35 = arith.addi %9, %c18_i32 : i32
    %c0_i32_31 = arith.constant 0 : i32
    %36 = arith.addi %35, %c0_i32_31 : i32
    %37 = arith.index_cast %36 : i32 to index
    %c0_32 = arith.constant 0 : index
    %38 = vector.load %arg8[%37, %c0_32] : memref<120x4xf32, #tpu.memory_space<vmem>>, vector<80x4xf32>
    %c1_33 = arith.constant 1 : index
    %c0_34 = arith.constant 0 : index
    %c0_35 = arith.constant 0 : index
    %c0_36 = arith.constant 0 : index
    %39 = vector.load %arg5[%c1_33, %c0_34, %c0_35, %c0_36] : memref<3x3x4x128xf32, #tpu.memory_space<vmem>>, vector<1x1x4x128xf32>
    %40 = vector.shape_cast %39 : vector<1x1x4x128xf32> to vector<4x128xf32>
    %cst_37 = arith.constant dense<0.000000e+00> : vector<80x128xf32>
    %41 = tpu.matmul %38, %40, %cst_37 {dimension_numbers = #tpu.dot_dimension_numbers<[1], [0], [0], [1], [0, 0, 1, 1], [], []>} : vector<80x4xf32>, vector<4x128xf32>, vector<80x128xf32> -> vector<80x128xf32>
    %42 = arith.addf %34, %41 : vector<80x128xf32>
    %c18_i32_38 = arith.constant 18 : i32
    %43 = arith.addi %9, %c18_i32_38 : i32
    %c1_i32_39 = arith.constant 1 : i32
    %44 = arith.addi %43, %c1_i32_39 : i32
    %45 = arith.index_cast %44 : i32 to index
    %c0_40 = arith.constant 0 : index
    %46 = vector.load %arg8[%45, %c0_40] : memref<120x4xf32, #tpu.memory_space<vmem>>, vector<80x4xf32>
    %c1_41 = arith.constant 1 : index
    %c1_42 = arith.constant 1 : index
    %c0_43 = arith.constant 0 : index
    %c0_44 = arith.constant 0 : index
    %47 = vector.load %arg5[%c1_41, %c1_42, %c0_43, %c0_44] : memref<3x3x4x128xf32, #tpu.memory_space<vmem>>, vector<1x1x4x128xf32>
    %48 = vector.shape_cast %47 : vector<1x1x4x128xf32> to vector<4x128xf32>
    %cst_45 = arith.constant dense<0.000000e+00> : vector<80x128xf32>
    %49 = tpu.matmul %46, %48, %cst_45 {dimension_numbers = #tpu.dot_dimension_numbers<[1], [0], [0], [1], [0, 0, 1, 1], [], []>} : vector<80x4xf32>, vector<4x128xf32>, vector<80x128xf32> -> vector<80x128xf32>
    %50 = arith.addf %42, %49 : vector<80x128xf32>
    %c18_i32_46 = arith.constant 18 : i32
    %51 = arith.addi %9, %c18_i32_46 : i32
    %c2_i32_47 = arith.constant 2 : i32
    %52 = arith.addi %51, %c2_i32_47 : i32
    %53 = arith.index_cast %52 : i32 to index
    %c0_48 = arith.constant 0 : index
    %54 = vector.load %arg8[%53, %c0_48] : memref<120x4xf32, #tpu.memory_space<vmem>>, vector<80x4xf32>
    %c1_49 = arith.constant 1 : index
    %c2_50 = arith.constant 2 : index
    %c0_51 = arith.constant 0 : index
    %c0_52 = arith.constant 0 : index
    %55 = vector.load %arg5[%c1_49, %c2_50, %c0_51, %c0_52] : memref<3x3x4x128xf32, #tpu.memory_space<vmem>>, vector<1x1x4x128xf32>
    %56 = vector.shape_cast %55 : vector<1x1x4x128xf32> to vector<4x128xf32>
    %cst_53 = arith.constant dense<0.000000e+00> : vector<80x128xf32>
    %57 = tpu.matmul %54, %56, %cst_53 {dimension_numbers = #tpu.dot_dimension_numbers<[1], [0], [0], [1], [0, 0, 1, 1], [], []>} : vector<80x4xf32>, vector<4x128xf32>, vector<80x128xf32> -> vector<80x128xf32>
    %58 = arith.addf %50, %57 : vector<80x128xf32>
    %c36_i32 = arith.constant 36 : i32
    %59 = arith.addi %9, %c36_i32 : i32
    %c0_i32_54 = arith.constant 0 : i32
    %60 = arith.addi %59, %c0_i32_54 : i32
    %61 = arith.index_cast %60 : i32 to index
    %c0_55 = arith.constant 0 : index
    %62 = vector.load %arg8[%61, %c0_55] : memref<120x4xf32, #tpu.memory_space<vmem>>, vector<80x4xf32>
    %c2_56 = arith.constant 2 : index
    %c0_57 = arith.constant 0 : index
    %c0_58 = arith.constant 0 : index
    %c0_59 = arith.constant 0 : index
    %63 = vector.load %arg5[%c2_56, %c0_57, %c0_58, %c0_59] : memref<3x3x4x128xf32, #tpu.memory_space<vmem>>, vector<1x1x4x128xf32>
    %64 = vector.shape_cast %63 : vector<1x1x4x128xf32> to vector<4x128xf32>
    %cst_60 = arith.constant dense<0.000000e+00> : vector<80x128xf32>
    %65 = tpu.matmul %62, %64, %cst_60 {dimension_numbers = #tpu.dot_dimension_numbers<[1], [0], [0], [1], [0, 0, 1, 1], [], []>} : vector<80x4xf32>, vector<4x128xf32>, vector<80x128xf32> -> vector<80x128xf32>
    %66 = arith.addf %58, %65 : vector<80x128xf32>
    %c36_i32_61 = arith.constant 36 : i32
    %67 = arith.addi %9, %c36_i32_61 : i32
    %c1_i32_62 = arith.constant 1 : i32
    %68 = arith.addi %67, %c1_i32_62 : i32
    %69 = arith.index_cast %68 : i32 to index
    %c0_63 = arith.constant 0 : index
    %70 = vector.load %arg8[%69, %c0_63] : memref<120x4xf32, #tpu.memory_space<vmem>>, vector<80x4xf32>
    %c2_64 = arith.constant 2 : index
    %c1_65 = arith.constant 1 : index
    %c0_66 = arith.constant 0 : index
    %c0_67 = arith.constant 0 : index
    %71 = vector.load %arg5[%c2_64, %c1_65, %c0_66, %c0_67] : memref<3x3x4x128xf32, #tpu.memory_space<vmem>>, vector<1x1x4x128xf32>
    %72 = vector.shape_cast %71 : vector<1x1x4x128xf32> to vector<4x128xf32>
    %cst_68 = arith.constant dense<0.000000e+00> : vector<80x128xf32>
    %73 = tpu.matmul %70, %72, %cst_68 {dimension_numbers = #tpu.dot_dimension_numbers<[1], [0], [0], [1], [0, 0, 1, 1], [], []>} : vector<80x4xf32>, vector<4x128xf32>, vector<80x128xf32> -> vector<80x128xf32>
    %74 = arith.addf %66, %73 : vector<80x128xf32>
    %c36_i32_69 = arith.constant 36 : i32
    %75 = arith.addi %9, %c36_i32_69 : i32
    %c2_i32_70 = arith.constant 2 : i32
    %76 = arith.addi %75, %c2_i32_70 : i32
    %77 = arith.index_cast %76 : i32 to index
    %c0_71 = arith.constant 0 : index
    %78 = vector.load %arg8[%77, %c0_71] : memref<120x4xf32, #tpu.memory_space<vmem>>, vector<80x4xf32>
    %c2_72 = arith.constant 2 : index
    %c2_73 = arith.constant 2 : index
    %c0_74 = arith.constant 0 : index
    %c0_75 = arith.constant 0 : index
    %79 = vector.load %arg5[%c2_72, %c2_73, %c0_74, %c0_75] : memref<3x3x4x128xf32, #tpu.memory_space<vmem>>, vector<1x1x4x128xf32>
    %80 = vector.shape_cast %79 : vector<1x1x4x128xf32> to vector<4x128xf32>
    %cst_76 = arith.constant dense<0.000000e+00> : vector<80x128xf32>
    %81 = tpu.matmul %78, %80, %cst_76 {dimension_numbers = #tpu.dot_dimension_numbers<[1], [0], [0], [1], [0, 0, 1, 1], [], []>} : vector<80x4xf32>, vector<4x128xf32>, vector<80x128xf32> -> vector<80x128xf32>
    %82 = arith.addf %74, %81 : vector<80x128xf32>
    %83 = vector.broadcast %6 : vector<1x128xf32> to vector<80x128xf32>
    %84 = arith.addf %82, %83 : vector<80x128xf32>
    %cst_77 = arith.constant 0.000000e+00 : f32
    %85 = vector.broadcast %cst_77 : f32 to vector<80x128xf32>
    %86 = arith.cmpf oge, %84, %85 : vector<80x128xf32>
    %cst_78 = arith.constant 2.000000e-01 : f32
    %87 = vector.broadcast %cst_78 : f32 to vector<80x128xf32>
    %88 = arith.mulf %87, %84 : vector<80x128xf32>
    %89 = arith.select %86, %84, %88 : vector<80x128xi1>, vector<80x128xf32>
    %c0_79 = arith.constant 0 : index
    %90 = arith.index_cast %9 : i32 to index
    %c0_80 = arith.constant 0 : index
    %91 = vector.load %arg7[%c0_79, %90, %c0_80] : memref<1x80x128xf32, #tpu.memory_space<vmem>>, vector<1x80x128xf32>
    %92 = vector.shape_cast %91 : vector<1x80x128xf32> to vector<80x128xf32>
    %93 = vector.shape_cast %89 : vector<80x128xf32> to vector<1x80x128xf32>
    tpu.vector_store %arg7[%c0_79, %90, %c0_80], %93 {strides = array<i32>} : memref<1x80x128xf32, #tpu.memory_space<vmem>>, vector<1x80x128xf32>,
    %c1_i32_81 = arith.constant 1 : i32
    return
  }
  func.func @transform_0(%arg0: i32, %arg1: i32, %arg2: i32) -> (i32, i32, i32) {
    %c0_i32 = arith.constant 0 : i32
    %c0_i32_0 = arith.constant 0 : i32
    return %arg0, %arg2, %c0_i32 : i32, i32, i32
  }
  func.func @transform_1(%arg0: i32, %arg1: i32, %arg2: i32) -> (i32, i32, i32) {
    %c1_i32 = arith.constant 1 : i32
    %0 = arith.addi %arg2, %c1_i32 : i32
    %c2_i32 = arith.constant 2 : i32
    %1 = arith.muli %0, %c2_i32 : i32
    %c0_i32 = arith.constant 0 : i32
    %c0_i32_0 = arith.constant 0 : i32
    return %arg0, %1, %c0_i32 : i32, i32, i32
  }
  func.func @transform_2(%arg0: i32, %arg1: i32, %arg2: i32) -> (i32, i32, i32, i32) {
    %c0_i32 = arith.constant 0 : i32
    %c0_i32_0 = arith.constant 0 : i32
    %c0_i32_1 = arith.constant 0 : i32
    %c0_i32_2 = arith.constant 0 : i32
    return %c0_i32, %c0_i32_0, %c0_i32_1, %arg1 : i32, i32, i32, i32
  }
  func.func @transform_3(%arg0: i32, %arg1: i32, %arg2: i32) -> (i32, i32) {
    %c0_i32 = arith.constant 0 : i32
    %c0_i32_0 = arith.constant 0 : i32
    return %c0_i32, %arg1 : i32, i32
  }
  func.func @transform_4(%arg0: i32, %arg1: i32, %arg2: i32) -> (i32, i32, i32) {
    %c0_i32 = arith.constant 0 : i32
    return %arg0, %arg2, %arg1 : i32, i32, i32
  }
}

</mosaic_0001>

<bundles_post_ra>
// kernel: tpu_custom_call.1
= control target key start
LH: loop header
LB: loop body
LE: loop exit
PB: predicated region body
PF: predicated region fallthrough
CT: control target
= control target key end

     0   :  { %9 = vsyncpa [#allocation4], 0  ;;  %s3116_s0 = inlined_call_operand.vmem [shape: f32[2,360,4], index: 0, kind: input, shape index: {}]   ;;  %s3117_s1 = inlined_call_operand.vmem [shape: f32[2,360,4], index: 1, kind: input, shape index: {}]   ;;  %s3118_s2 = inlined_call_operand.vmem [shape: f32[3,3,4,128], index: 2, kind: input, shape index: {}]   ;;  %s3119_s3 = inlined_call_operand.vmem [shape: f32[1,128], index: 3, kind: input, shape index: {}]   ;;  %s3120_s4 = inlined_call_operand.hbm [shape: f32[2,320,128], index: 4, kind: output, shape index: {}]  }
   0x1   :  { %11 = vsyncpa [#allocation4 + $0x1], 0  ;;  %s2771_s15 = smov 0   ;;  %s2773_s16 = smov 0  }
   0x2   :  { %s2775_s17 = smov 0   ;;  %s2777_s18 = smov 0  }
   0x3   :  { %s2779_s19 = smov 0   ;;  %s2781_s20 = smov 0  }
   0x4   :  { %s2783_s21 = smov 0   ;;  %s2785_s22 = smov 0  }
   0x5 LB: > { %s2107_s23 = sadd.s32 4294967295, %s2741_s22   ;;  %s2108_s24 = sadd.s32 4294967294, %s2741_s22   ;;  %s2741_s22 = sphi %s2785_s22, %s17_s22   ;;  %s2737_s21 = sphi %s2783_s21, %s3129_s21   ;;  %s2733_s20 = sphi %s2781_s20, %s3128_s20   ;;  %s2729_s19 = sphi %s2779_s19, %s3127_s19   ;;  %s2725_s18 = sphi %s2777_s18, %s3126_s18   ;;  %s2721_s17 = sphi %s2775_s17, %s3125_s17   ;;  %s2717_s16 = sphi %s2773_s16, %s3124_s16   ;;  %s2713_s15 = sphi %s2771_s15, %s3123_s15  }
   0x6   : > { %s29_s25 = sadd.s32 1, %s2733_s20  ;;  %s36_s26 = sadd.s32 1, %s2737_s21 }
   0x7   : > { %p30_p0 = scmp.ge.s32.totalorder %s29_s25, 4  ;;  %p169_p1 = scmp.ne.s32.totalorder %s2721_s17, %s2717_s16 }
   0x8   : > { %p170_p2 = scmp.eq.s32.totalorder %s2107_s23, 7  ;;  %p175_p5 = scmp.ne.s32.totalorder %s2717_s16, %s2713_s15 }
   0x9   : > { %s3131_s25 = smov (%p30_p0, %s29_s25), 0  ;;  %s3133_s26 = smov (!%p30_p0, %s36_s26), %s2737_s21 }
   0xa   : > { %s153_s27 = ssub.s32 %s2733_s20, %s3131_s25  ;;  %p2822_p3 = por %p170_p2, %p169_p1 }
   0xb   : > { %p38_p4 = scmp.ge.s32.totalorder %s3133_s26, 2  ;;  %p176_p6 = scmp.eq.s32.totalorder %s2108_s24, 7 }
   0xc   : > { %p2115_p7 = scmp.ge.s32.totalorder %s2741_s22, 1  ;;  %p245_p9 = scmp.lt.s32.totalorder %s2741_s22, 9 }
   0xd   : > { %s3135_s26 = smov (%p38_p4, %s3133_s26), 0  ;;  %p2831_p8 = por %p176_p6, %p175_p5 }
   0xe   : > { %s152_s30 = ssub.s32 %s2737_s21, %s3135_s26  ;;  %s159_s5 = sadd.s32 1, %s2721_s17 }
   0xf   : > { %s154_s6 = sor.u32 %s153_s27, %s152_s30  ;;  %p246_p10 = pnand %p2115_p7, %p245_p9 }
  0x10   : > { %p157_p11 = scmp.eq.s32.totalorder %s154_s6, 0  ;;  %vm424_vm0 = vcmask (!%p246_p10), 1043456   ;;  %v2845_v0 = vld [vmem:[%s3118_s2 + $0x10] sm:$0xf] (!%p246_p10)  ;;  %v2120_v1 = vld [vmem:[%s3118_s2 + $0x4] sm:$0xf] (!%p246_p10) }
  0x11   : > { %249 = sbr.rel (%p246_p10) target bundleno = 365 (0x16d), region = 36  ;;  %2404 = vmatprep.subr.msk.mxu0 (!%p246_p10), %vm424_vm0, %v2845_v0  ;;  %2336 = vmatprep.subr.msk.mxu1 (!%p246_p10), %vm424_vm0, %v2120_v1  ;;  %p302_p12 = scmp.lt.s32.totalorder (!%p246_p10), %s2729_s19, 1  ;;  %v2860_v2 = vld [vmem:[%s3118_s2 + $0x14] sm:$0xf] (!%p246_p10)  ;;  %v2865_v3 = vld [vmem:[%s3118_s2] sm:$0xf] (!%p246_p10) }
  0x12   : > { %s2840_s7 = scalar_select %p157_p11, %s2721_s17, %s159_s5  }
  0x13   : > { %s2851_s12 = smul.u32 (!%p246_p10), 10, %s2725_s18  ;;  %2405 = vmatpush3.msk.msra.mxu0 (!%p246_p10), %vm424_vm0, %v2845_v0  ;;  %2337 = vmatpush3.msk.msra.mxu1 (!%p246_p10), %vm424_vm0, %v2120_v1  ;;  %s315_s27 = sadd.s32 (!%p246_p10), 1, %s2725_s18  ;;  %vm347_vm1 = vcmask (!%p246_p10), 31744   ;;  %v2191_v25 = vld [vmem:[%s3118_s2 + $0x18] sm:$0xf] (!%p246_p10) }
  0x14   : > { %2421 = vmatprep.subr.msk.mxu0 (!%p246_p10), %vm424_vm0, %v2860_v2  ;;  %2353 = vmatprep.subr.msk.mxu1 (!%p246_p10), %vm424_vm0, %v2865_v3  ;;  %s2118_s8 = smul.u32 (!%p246_p10), 10, %s315_s27  ;;  %v2143_v27 = vld [vmem:[%s3118_s2 + $0x8] sm:$0xf] (!%p246_p10)  ;;  %v2203_v39 = vld [vmem:[%s3118_s2 + $0x1c] sm:$0xf] (!%p246_p10)  ;;  %s294_s24 = sand.u32 (!%p246_p10), 1, %s2717_s16  }
  0x15   : > { %p304_p13 = scmp.lt.s32.totalorder (!%p246_p10), %s2851_s12, 44  ;;  %v2155_v48 = vld [vmem:[%s3118_s2 + $0xc] sm:$0xf] (!%p246_p10)  ;;  %v2215_v58 = vld [vmem:[%s3118_s2 + $0x20] sm:$0xf] (!%p246_p10) }
  0x16   : > { %p320_p0 = scmp.lt.s32.totalorder (!%p246_p10), %s2118_s8, 44 }
  0x18   : > { %s303_s30 = scalar_select %p302_p12, %s2729_s19, 1 }
  0x19   : > { %s305_s5 = scalar_select %p304_p13, %s2851_s12, 44 }
  0x1a   : > { %s2572_s6 = smul.u32 45, %s303_s30  ;;  %s3137_s8 = smov (!%p320_p0, %s2118_s8), 44 }
  0x1c   : > { %s307_s9 = sadd.s32 %s2572_s6, %s305_s5  ;;  %s323_s18 = sadd.s32 %s2572_s6, %s3137_s8 }
  0x1d   : > { %s2116_s10 = sshll.u32 %s307_s9, 3  ;;  %s2119_s23 = sshll.u32 %s323_s18, 3 }
  0x1e   : > { %s309_s14 = scalar_lea.vmem %s3116_s0, %s2116_s10  ;;  %s325_s30 = scalar_lea.vmem %s3117_s1, %s2119_s23 }
  0x1f   : > { %v337_v4 = vld [vmem:[%s309_s14] sm:$0xff]  ;;  %v338_v5 = vld [vmem:[%s309_s14 + $0x8] sm:$0xff]  ;;  %v339_v6 = vld [vmem:[%s309_s14 + $0x10] sm:$0xff]  ;;  %s2571_s5 = smul.u32 80, %s294_s24  ;;  %s2743_s23 = smov [#allocation3]  }
  0x20   : > { %348 = vst.msk [vmem:[#allocation2] sm:$0xff] %vm347_vm1, %v337_v4  ;;  %349 = vst.msk [vmem:[#allocation2 + $0x8] sm:$0xff] %vm347_vm1, %v338_v5  ;;  %v340_v7 = vld [vmem:[%s309_s14 + $0x18] sm:$0xff]  ;;  %v341_v8 = vld [vmem:[%s309_s14 + $0x20] sm:$0xff]  ;;  %s2573_s8 = smul.u32 40, %s2729_s19  ;;  %s2651_s27 = sshll.u32 %s2743_s23, 4  ;;  %s2652_s27 = int_to_ptr.vmem [resolvable:$false] %s2651_s27 }
  0x21   : > { %350 = vst.msk [vmem:[#allocation2 + $0x10] sm:$0xff] %vm347_vm1, %v339_v6  ;;  %v342_v9 = vld [vmem:[%s309_s14 + $0x28] sm:$0xff]  ;;  %351 = vst.msk [vmem:[#allocation2 + $0x18] sm:$0xff] %vm347_vm1, %v340_v7  ;;  %v343_v10 = vld [vmem:[%s309_s14 + $0x30] sm:$0xff]  ;;  %s3033_s6 = scalar_lea.vmem [#allocation3], %s2571_s5 }
  0x22   : > { %352 = vst.msk [vmem:[#allocation2 + $0x20] sm:$0xff] %vm347_vm1, %v341_v8  ;;  %353 = vst.msk [vmem:[#allocation2 + $0x28] sm:$0xff] %vm347_vm1, %v342_v9  ;;  %v344_v11 = vld [vmem:[%s309_s14 + $0x38] sm:$0xff]  ;;  %v345_v12 = vld [vmem:[%s309_s14 + $0x40] sm:$0xff]  ;;  %s1965_s19 = sadd.s32 %s2573_s8, %s2851_s12  ;;  %s1968_s10 = sshll.u32 %s3033_s6, 4  ;;  %s3058_s10 = int_to_ptr.vmem [resolvable:$true] %s1968_s10 }
  0x23   : > { %354 = vst.msk [vmem:[#allocation2 + $0x30] sm:$0xff] %vm347_vm1, %v343_v10  ;;  %355 = vst.msk [vmem:[#allocation2 + $0x38] sm:$0xff] %vm347_vm1, %v344_v11  ;;  %v346_v13 = vld [vmem:[%s309_s14 + $0x48] sm:$0xff]  ;;  %v358_v14 = vld [vmem:[%s325_s30] sm:$0xff]  ;;  %s2228_s9 = sshll.u32 %s1965_s19, 7  ;;  %s3064_s14 = scalar_lea.sflag [#allocation4], %s294_s24 }
  0x24   : > { %356 = vst.msk [vmem:[#allocation2 + $0x40] sm:$0xff] %vm347_vm1, %v345_v12  ;;  %357 = vst.msk [vmem:[#allocation2 + $0x48] sm:$0xff] %vm347_vm1, %v346_v13  ;;  %v359_v15 = vld [vmem:[%s325_s30 + $0x8] sm:$0xff]  ;;  %v360_v16 = vld [vmem:[%s325_s30 + $0x10] sm:$0xff]  ;;  %s3056_s13 = scalar_lea.hbm %s3120_s4, %s2228_s9  ;;  %s2647_s18 = scalar_lea.vmem %s3058_s10, 1280 }
  0x25   : > { %363 = vst.msk [vmem:[#allocation2 + $0x50] sm:$0xff] %vm347_vm1, %v358_v14  ;;  %364 = vst.msk [vmem:[#allocation2 + $0x58] sm:$0xff] %vm347_vm1, %v359_v15  ;;  %v361_v17 = vld [vmem:[%s325_s30 + $0x18] sm:$0xff]  ;;  %v362_v18 = vld [vmem:[%s325_s30 + $0x20] sm:$0xff]  ;;  %p2648_p1 = scmp.ne.s32.totalorder %s3058_s10, %s2647_s18  ;;  %s2653_s30 = scalar_lea.vmem %s2652_s27, 2560 }
  0x26   : > { %365 = vst.msk [vmem:[#allocation2 + $0x60] sm:$0xff] %vm347_vm1, %v360_v16  ;;  %366 = vst.msk [vmem:[#allocation2 + $0x68] sm:$0xff] %vm347_vm1, %v361_v17  ;;  %p2654_p5 = scmp.lt.s32.totalorder %s3058_s10, %s2652_s27  ;;  %p2655_p6 = scmp.lt.s32.totalorder %s2653_s30, %s2647_s18 }
  0x27   : > { %367 = vst.msk [vmem:[#allocation2 + $0x70] sm:$0xff] %vm347_vm1, %v362_v18  ;;  %v382_v19 = vld [vmem:[#allocation2 + $0x1] sm:$0xff]  ;;  %p2649_p2 = pnand %p2648_p1, %p2822_p3 }
  0x28   : > { %v383_v20 = vld [vmem:[#allocation2 + $0x9] sm:$0xff]  ;;  %2338 = vmatprep.mubr.msk.f32.mxu1 %vm347_vm1, %v382_v19  ;;  %v1037_v21 = vld [vmem:[#allocation2 + $0x13] sm:$0xff]  ;;  %v369_v42 = vld [vmem:[#allocation2] sm:$0xff]  ;;  %p2656_p7 = por %p2655_p6, %p2654_p5 }
  0x29   : > { %v1038_v22 = vld [vmem:[#allocation2 + $0x1b] sm:$0xff]  ;;  %v384_v23 = vld [vmem:[#allocation2 + $0x11] sm:$0xff]  ;;  %2406 = vmatprep.mubr.msk.f32.mxu0 %vm347_vm1, %v1037_v21  ;;  %2339 = vmatmul.mubr.msk.f32.vlgmr.msra.gmra.mrb[0].mxu1 %vm347_vm1, %v383_v20  ;;  %v1039_v24 = vld [vmem:[#allocation2 + $0x23] sm:$0xff]  ;;  %p2650_p4 = pneg %p2649_p2 }
  0x2a   : > { %2407 = vmatmul.mubr.msk.f32.vlgmr.msra.gmra.mrb[0].mxu0 %vm347_vm1, %v1038_v22  ;;  %2341 = vmatprep.mubr.msk.f32.mxu1 %vm347_vm1, %v384_v23  ;;  %v385_v26 = vld [vmem:[#allocation2 + $0x19] sm:$0xff]  ;;  %v1040_v28 = vld [vmem:[#allocation2 + $0x2b] sm:$0xff]  ;;  %v386_v29 = vld [vmem:[#allocation2 + $0x21] sm:$0xff] }
  0x2b   : > { %2422 = vmatpush3.msk.msra.mxu0 %vm424_vm0, %v2860_v2  ;;  %2409 = vmatprep.mubr.msk.f32.mxu0 %vm347_vm1, %v1039_v24  ;;  %v1041_v30 = vld [vmem:[#allocation2 + $0x33] sm:$0xff]  ;;  %v387_v31 = vld [vmem:[#allocation2 + $0x29] sm:$0xff]  ;;  %v1042_v32 = vld [vmem:[#allocation2 + $0x3b] sm:$0xff]  ;;  %p2657_p9 = pnand %p2656_p7, %p2650_p4 }
  0x2c   : > { %2354 = vmatpush3.msk.msra.mxu1 %vm424_vm0, %v2865_v3  ;;  %2438 = vmatprep.subr.msk.mxu0 %vm424_vm0, %v2191_v25  ;;  %v388_v33 = vld [vmem:[#allocation2 + $0x31] sm:$0xff]  ;;  %v389_v35 = vld [vmem:[#allocation2 + $0x39] sm:$0xff]  ;;  %v390_v37 = vld [vmem:[#allocation2 + $0x41] sm:$0xff] }
  0x2d   : > { %2342 = vmatmul.mubr.msk.f32.gmra.mrb[2].mxu1 %vm347_vm1, %v385_v26  ;;  %2370 = vmatprep.subr.msk.mxu1 %vm424_vm0, %v2143_v27  ;;  %v1209_v34 = vld [vmem:[#allocation2 + $0x14] sm:$0xff]  ;;  %v1210_v36 = vld [vmem:[#allocation2 + $0x1c] sm:$0xff]  ;;  %v1211_v38 = vld [vmem:[#allocation2 + $0x24] sm:$0xff] }
  0x2e   : > { %2410 = vmatmul.mubr.msk.f32.gmra.mrb[2].mxu0 %vm347_vm1, %v1040_v28  ;;  %2344 = vmatprep.mubr.msk.f32.mxu1 %vm347_vm1, %v386_v29  ;;  %v391_v40 = vld [vmem:[#allocation2 + $0x49] sm:$0xff]  ;;  %v1213_v43 = vld [vmem:[#allocation2 + $0x34] sm:$0xff]  ;;  %v1214_v45 = vld [vmem:[#allocation2 + $0x3c] sm:$0xff] }
  0x2f   : > { %2412 = vmatprep.mubr.msk.f32.mxu0 %vm347_vm1, %v1041_v30  ;;  %v1212_v41 = vld [vmem:[#allocation2 + $0x2c] sm:$0xff]  ;;  %v1215_v47 = vld [vmem:[#allocation2 + $0x44] sm:$0xff]  ;;  %v372_v49 = vld [vmem:[#allocation2 + $0x18] sm:$0xff] }
  0x30   : > { %v370_v44 = vld [vmem:[#allocation2 + $0x8] sm:$0xff]  ;;  %v371_v46 = vld [vmem:[#allocation2 + $0x10] sm:$0xff]  ;;  %v373_v51 = vld [vmem:[#allocation2 + $0x20] sm:$0xff] }
  0x31   : > { %2345 = vmatmul.mubr.msk.f32.gmra.mrb[4].mxu1 %vm347_vm1, %v387_v31  ;;  %v1216_v50 = vld [vmem:[#allocation2 + $0x4c] sm:$0xff]  ;;  %v1217_v52 = vld [vmem:[#allocation2 + $0x54] sm:$0xff]  ;;  %v1218_v54 = vld [vmem:[#allocation2 + $0x5c] sm:$0xff] }
  0x32   : > { %2413 = vmatmul.mubr.msk.f32.gmra.mrb[4].mxu0 %vm347_vm1, %v1042_v32  ;;  %2347 = vmatprep.mubr.msk.f32.mxu1 %vm347_vm1, %v388_v33  ;;  %v374_v53 = vld [vmem:[#allocation2 + $0x28] sm:$0xff]  ;;  %v375_v55 = vld [vmem:[#allocation2 + $0x30] sm:$0xff]  ;;  %v376_v56 = vld [vmem:[#allocation2 + $0x38] sm:$0xff] }
  0x33   : > { %2423 = vmatprep.mubr.msk.f32.mxu0 %vm347_vm1, %v1209_v34  ;;  %v377_v57 = vld [vmem:[#allocation2 + $0x40] sm:$0xff]  ;;  %v378_v59 = vld [vmem:[#allocation2 + $0x48] sm:$0xff]  ;;  %v695_v62 = vld [vmem:[#allocation2 + $0x12] sm:$0xff] }
  0x34   : > { %v693_v60 = vld [vmem:[#allocation2 + $0x2] sm:$0xff]  ;;  %v694_v61 = vld [vmem:[#allocation2 + $0xa] sm:$0xff]  ;;  %v696_v63 = vld [vmem:[#allocation2 + $0x1a] sm:$0xff] }
  0x35   : > { %2348 = vmatmul.mubr.msk.f32.gmra.mrb[6].mxu1 %vm347_vm1, %v389_v35  ;;  %v697_v1 = vld [vmem:[#allocation2 + $0x22] sm:$0xff]  ;;  %v698_v3 = vld [vmem:[#allocation2 + $0x2a] sm:$0xff]  ;;  %v699_v5 = vld [vmem:[#allocation2 + $0x32] sm:$0xff] }
  0x36   : > { %2424 = vmatmul.mubr.msk.f32.vlgmr.msra.gmra.mrb[0].mxu0 %vm347_vm1, %v1210_v36  ;;  %2350 = vmatprep.mubr.msk.f32.mxu1 %vm347_vm1, %v390_v37  ;;  %v1389_v2 = vld [vmem:[#allocation2 + $0x64] sm:$0xff]  ;;  %v1390_v4 = vld [vmem:[#allocation2 + $0x6c] sm:$0xff]  ;;  %v700_v7 = vld [vmem:[#allocation2 + $0x3a] sm:$0xff] }
  0x37   : > { %2439 = vmatpush3.msk.msra.mxu0 %vm424_vm0, %v2191_v25  ;;  %2426 = vmatprep.mubr.msk.f32.mxu0 %vm347_vm1, %v1211_v38  ;;  %v1553_v6 = vld [vmem:[#allocation2 + $0x25] sm:$0xff]  ;;  %v1554_v8 = vld [vmem:[#allocation2 + $0x2d] sm:$0xff]  ;;  %v1555_v10 = vld [vmem:[#allocation2 + $0x35] sm:$0xff] }
  0x38   : > { %2455 = vmatprep.subr.msk.mxu0 %vm424_vm0, %v2203_v39  ;;  %v701_v9 = vld [vmem:[#allocation2 + $0x42] sm:$0xff]  ;;  %v702_v11 = vld [vmem:[#allocation2 + $0x4a] sm:$0xff]  ;;  %v1559_v15 = vld [vmem:[#allocation2 + $0x55] sm:$0xff] }
  0x39   : > { %2351 = vmatmul.mubr.msk.f32.gmra.mrb[8].mxu1 %vm347_vm1, %v391_v40  ;;  %v1556_v12 = vld [vmem:[#allocation2 + $0x3d] sm:$0xff]  ;;  %v1557_v13 = vld [vmem:[#allocation2 + $0x45] sm:$0xff]  ;;  %v1558_v14 = vld [vmem:[#allocation2 + $0x4d] sm:$0xff] }
  0x3a   : > { %2427 = vmatmul.mubr.msk.f32.gmra.mrb[2].mxu0 %vm347_vm1, %v1212_v41  ;;  %2355 = vmatprep.mubr.msk.f32.mxu1 %vm347_vm1, %v369_v42  ;;  %v1560_v16 = vld [vmem:[#allocation2 + $0x5d] sm:$0xff]  ;;  %v1561_v17 = vld [vmem:[#allocation2 + $0x65] sm:$0xff]  ;;  %v1562_v18 = vld [vmem:[#allocation2 + $0x6d] sm:$0xff] }
  0x3b   : > { %2429 = vmatprep.mubr.msk.f32.mxu0 %vm347_vm1, %v1213_v43  ;;  %v1725_v19 = vld [vmem:[#allocation2 + $0x26] sm:$0xff]  ;;  %v873_v20 = vld [vmem:[#allocation2 + $0x52] sm:$0xff]  ;;  %v874_v22 = vld [vmem:[#allocation2 + $0x5a] sm:$0xff] }
  0x3c   : > { %v1727_v21 = vld [vmem:[#allocation2 + $0x36] sm:$0xff]  ;;  %v1728_v23 = vld [vmem:[#allocation2 + $0x3e] sm:$0xff]  ;;  %v1729_v25 = vld [vmem:[#allocation2 + $0x46] sm:$0xff] }
  0x3d   : > { %2356 = vmatmul.mubr.msk.f32.vlgmr.msra.gmra.mrb[0].mxu1 %vm347_vm1, %v370_v44  ;;  %v1043_v24 = vld [vmem:[#allocation2 + $0x43] sm:$0xff]  ;;  %v1044_v26 = vld [vmem:[#allocation2 + $0x4b] sm:$0xff]  ;;  %v1045_v28 = vld [vmem:[#allocation2 + $0x53] sm:$0xff] }
  0x3e   : > { %2430 = vmatmul.mubr.msk.f32.gmra.mrb[4].mxu0 %vm347_vm1, %v1214_v45  ;;  %2358 = vmatprep.mubr.msk.f32.mxu1 %vm347_vm1, %v371_v46  ;;  %v1731_v29 = vld [vmem:[#allocation2 + $0x56] sm:$0xff]  ;;  %v1732_v31 = vld [vmem:[#allocation2 + $0x5e] sm:$0xff]  ;;  %v1733_v32 = vld [vmem:[#allocation2 + $0x66] sm:$0xff] }
  0x3f   : > { %2432 = vmatprep.mubr.msk.f32.mxu0 %vm347_vm1, %v1215_v47  ;;  %2371 = vmatpush3.msk.msra.mxu1 %vm424_vm0, %v2143_v27  ;;  %v1730_v27 = vld [vmem:[#allocation2 + $0x4e] sm:$0xff]  ;;  %v1046_v30 = vld [vmem:[#allocation2 + $0x5b] sm:$0xff] }
  0x40   : > { %2387 = vmatprep.subr.msk.mxu1 %vm424_vm0, %v2155_v48  ;;  %v1734_v33 = vld [vmem:[#allocation2 + $0x6e] sm:$0xff] }
  0x41   : > { %2359 = vmatmul.mubr.msk.f32.gmra.mrb[2].mxu1 %vm347_vm1, %v372_v49  ;;  %v3026_v40 = vld [vmem:[%s3119_s3] ss:$0 sm:$0xff] }
  0x42   : > { %2433 = vmatmul.mubr.msk.f32.gmra.mrb[6].mxu0 %vm347_vm1, %v1216_v50  ;;  %2361 = vmatprep.mubr.msk.f32.mxu1 %vm347_vm1, %v373_v51 }
  0x43   : > { %2435 = vmatprep.mubr.msk.f32.mxu0 %vm347_vm1, %v1217_v52 }
  0x45   : > { %2362 = vmatmul.mubr.msk.f32.gmra.mrb[4].mxu1 %vm347_vm1, %v374_v53 }
  0x46   : > { %2436 = vmatmul.mubr.msk.f32.gmra.mrb[8].mxu0 %vm347_vm1, %v1218_v54  ;;  %2364 = vmatprep.mubr.msk.f32.mxu1 %vm347_vm1, %v375_v55 }
  0x47   : > { %2440 = vmatprep.mubr.msk.f32.mxu0 %vm347_vm1, %v1211_v38 }
  0x49   : > { %2365 = vmatmul.mubr.msk.f32.gmra.mrb[6].mxu1 %vm347_vm1, %v376_v56 }
  0x4a   : > { %2441 = vmatmul.mubr.msk.f32.vlgmr.msra.gmra.mrb[0].mxu0 %vm347_vm1, %v1212_v41  ;;  %2367 = vmatprep.mubr.msk.f32.mxu1 %vm347_vm1, %v377_v57 }
  0x4b   : > { %2456 = vmatpush3.msk.msra.mxu0 %vm424_vm0, %v2203_v39  ;;  %2443 = vmatprep.mubr.msk.f32.mxu0 %vm347_vm1, %v1213_v43 }
  0x4c   : > { %2472 = vmatprep.subr.msk.mxu0 %vm424_vm0, %v2215_v58 }
  0x4d   : > { %2368 = vmatmul.mubr.msk.f32.gmra.mrb[8].mxu1 %vm347_vm1, %v378_v59 }
  0x4e   : > { %2444 = vmatmul.mubr.msk.f32.gmra.mrb[2].mxu0 %vm347_vm1, %v1214_v45  ;;  %2372 = vmatprep.mubr.msk.f32.mxu1 %vm347_vm1, %v693_v60 }
  0x4f   : > { %2446 = vmatprep.mubr.msk.f32.mxu0 %vm347_vm1, %v1215_v47 }
  0x51   : > { %2373 = vmatmul.mubr.msk.f32.vlgmr.msra.gmra.mrb[0].mxu1 %vm347_vm1, %v694_v61 }
  0x52   : > { %2447 = vmatmul.mubr.msk.f32.gmra.mrb[4].mxu0 %vm347_vm1, %v1216_v50  ;;  %2375 = vmatprep.mubr.msk.f32.mxu1 %vm347_vm1, %v695_v62 }
  0x53   : > { %2449 = vmatprep.mubr.msk.f32.mxu0 %vm347_vm1, %v1217_v52  ;;  %2388 = vmatpush3.msk.msra.mxu1 %vm424_vm0, %v2155_v48 }
  0x54   : > { %2489 = vmatprep.subr.msk.mxu1 %vm424_vm0, %v2845_v0 }
  0x55   : > { %2376 = vmatmul.mubr.msk.f32.gmra.mrb[2].mxu1 %vm347_vm1, %v696_v63 }
  0x56   : > { %2450 = vmatmul.mubr.msk.f32.gmra.mrb[6].mxu0 %vm347_vm1, %v1218_v54  ;;  %2378 = vmatprep.mubr.msk.f32.mxu1 %vm347_vm1, %v697_v1 }
  0x57   : > { %2452 = vmatprep.mubr.msk.f32.mxu0 %vm347_vm1, %v1389_v2 }
  0x59   : > { %2379 = vmatmul.mubr.msk.f32.gmra.mrb[4].mxu1 %vm347_vm1, %v698_v3 }
  0x5a   : > { %2453 = vmatmul.mubr.msk.f32.gmra.mrb[8].mxu0 %vm347_vm1, %v1390_v4  ;;  %2381 = vmatprep.mubr.msk.f32.mxu1 %vm347_vm1, %v699_v5 }
  0x5b   : > { %2457 = vmatprep.mubr.msk.f32.mxu0 %vm347_vm1, %v1553_v6 }
  0x5d   : > { %2382 = vmatmul.mubr.msk.f32.gmra.mrb[6].mxu1 %vm347_vm1, %v700_v7 }
  0x5e   : > { %2458 = vmatmul.mubr.msk.f32.vlgmr.msra.gmra.mrb[0].mxu0 %vm347_vm1, %v1554_v8  ;;  %2384 = vmatprep.mubr.msk.f32.mxu1 %vm347_vm1, %v701_v9 }
  0x5f   : > { %2473 = vmatpush3.msk.msra.mxu0 %vm424_vm0, %v2215_v58  ;;  %2460 = vmatprep.mubr.msk.f32.mxu0 %vm347_vm1, %v1555_v10 }
  0x61   : > { %2385 = vmatmul.mubr.msk.f32.gmra.mrb[8].mxu1 %vm347_vm1, %v702_v11 }
  0x62   : > { %2461 = vmatmul.mubr.msk.f32.gmra.mrb[2].mxu0 %vm347_vm1, %v1556_v12  ;;  %2389 = vmatprep.mubr.msk.f32.mxu1 %vm347_vm1, %v695_v62 }
  0x63   : > { %2463 = vmatprep.mubr.msk.f32.mxu0 %vm347_vm1, %v1557_v13 }
  0x65   : > { %2390 = vmatmul.mubr.msk.f32.vlgmr.msra.gmra.mrb[0].mxu1 %vm347_vm1, %v696_v63 }
  0x66   : > { %2464 = vmatmul.mubr.msk.f32.gmra.mrb[4].mxu0 %vm347_vm1, %v1558_v14  ;;  %2392 = vmatprep.mubr.msk.f32.mxu1 %vm347_vm1, %v697_v1 }
  0x67   : > { %2466 = vmatprep.mubr.msk.f32.mxu0 %vm347_vm1, %v1559_v15  ;;  %2490 = vmatpush3.msk.msra.mxu1 %vm424_vm0, %v2845_v0  ;;  %v1726_v0 = vld [vmem:[#allocation2 + $0x2e] sm:$0xff] }
  0x69   : > { %2393 = vmatmul.mubr.msk.f32.gmra.mrb[2].mxu1 %vm347_vm1, %v698_v3 }
  0x6a   : > { %2467 = vmatmul.mubr.msk.f32.gmra.mrb[6].mxu0 %vm347_vm1, %v1560_v16  ;;  %2395 = vmatprep.mubr.msk.f32.mxu1 %vm347_vm1, %v699_v5 }
  0x6b   : > { %2469 = vmatprep.mubr.msk.f32.mxu0 %vm347_vm1, %v1561_v17 }
  0x6d   : > { %2396 = vmatmul.mubr.msk.f32.gmra.mrb[4].mxu1 %vm347_vm1, %v700_v7 }
  0x6e   : > { %2470 = vmatmul.mubr.msk.f32.gmra.mrb[8].mxu0 %vm347_vm1, %v1562_v18  ;;  %2398 = vmatprep.mubr.msk.f32.mxu1 %vm347_vm1, %v701_v9 }
  0x6f   : > { %2474 = vmatprep.mubr.msk.f32.mxu0 %vm347_vm1, %v1725_v19 }
  0x71   : > { %2399 = vmatmul.mubr.msk.f32.gmra.mrb[6].mxu1 %vm347_vm1, %v702_v11 }
  0x72   : > { %2475 = vmatmul.mubr.msk.f32.vlgmr.msra.gmra.mrb[0].mxu0 %vm347_vm1, %v1726_v0  ;;  %2401 = vmatprep.mubr.msk.f32.mxu1 %vm347_vm1, %v873_v20 }
  0x73   : > { %2477 = vmatprep.mubr.msk.f32.mxu0 %vm347_vm1, %v1727_v21 }
  0x75   : > { %2402 = vmatmul.mubr.msk.f32.gmra.mrb[8].mxu1 %vm347_vm1, %v874_v22 }
  0x76   : > { %2478 = vmatmul.mubr.msk.f32.gmra.mrb[2].mxu0 %vm347_vm1, %v1728_v23  ;;  %2415 = vmatprep.mubr.msk.f32.mxu1 %vm347_vm1, %v1043_v24 }
  0x77   : > { %2480 = vmatprep.mubr.msk.f32.mxu0 %vm347_vm1, %v1729_v25 }
  0x79   : > { %2416 = vmatmul.mubr.msk.f32.vlgmr.msra.gmra.mrb[6].mxu1 %vm347_vm1, %v1044_v26 }
  0x7a   : > { %2481 = vmatmul.mubr.msk.f32.gmra.mrb[4].mxu0 %vm347_vm1, %v1730_v27  ;;  %2418 = vmatprep.mubr.msk.f32.mxu1 %vm347_vm1, %v1045_v28 }
  0x7b   : > { %2483 = vmatprep.mubr.msk.f32.mxu0 %vm347_vm1, %v1731_v29 }
  0x7d   : > { %2419 = vmatmul.mubr.msk.f32.gmra.mrb[8].mxu1 %vm347_vm1, %v1046_v30 }
  0x7e   : > { %2484 = vmatmul.mubr.msk.f32.gmra.mrb[6].mxu0 %vm347_vm1, %v1732_v31 }
  0x7f   : > { %2486 = vmatprep.mubr.msk.f32.mxu0 %vm347_vm1, %v1733_v32 }
  0x82   : > { %2487 = vmatmul.mubr.msk.f32.gmra.mrb[8].mxu0 %vm347_vm1, %v1734_v33 }
 0x138   : > { %v2391_v34 = vpop.f32.mrb[0].mxu1 }
 0x139   : > { %v976_v35 = vpop.f32.mrb[1].mxu1 }
 0x13c   : > { %v2394_v36 = vpop.f32.mrb[2].mxu1 }
 0x13d   : > { %v986_v37 = vpop.f32.mrb[3].mxu1 }
 0x140   : > { %v2397_v38 = vpop.f32.mrb[4].mxu1 }
 0x141   : > { %v996_v39 = vpop.f32.mrb[5].mxu1 }
 0x145   : > { %v2476_v41 = vpop.f32.mrb[0].mxu0 }
 0x146   : > { %v2491_v42 = vadd.f32 %v2476_v41, %v2391_v34  ;;  %v1836_v43 = vpop.f32.mrb[1].mxu0 }
 0x147   : > { %v2492_v44 = vadd.f32 %v1836_v43, %v976_v35 }
 0x148   : > { %v1902_v45 = vadd.f32 %v2491_v42, %v3026_v40 }
 0x149   : > { %v1901_v46 = vadd.f32 %v2492_v44, %v3026_v40  ;;  %v2479_v47 = vpop.f32.mrb[2].mxu0 }
 0x14a   : > { %vm1912_vm2 = vcmp.ge.f32.partialorder %v1902_v45, 0.0  ;;  %v1922_v48 = vmul.f32 0.2, %v1902_v45  ;;  %v2493_v49 = vadd.f32 %v2479_v47, %v2394_v36  ;;  %v1846_v50 = vpop.f32.mrb[3].mxu0 }
 0x14b   : > { %vm1911_vm3 = vcmp.ge.f32.partialorder %v1901_v46, 0.0  ;;  %v1921_v51 = vmul.f32 0.2, %v1901_v46  ;;  %v2494_v52 = vadd.f32 %v1846_v50, %v986_v37 }
 0x14c   : > { %v1932_v53 = vsel %vm1912_vm2, %v1902_v45, %v1922_v48  ;;  %v1904_v54 = vadd.f32 %v2493_v49, %v3026_v40  ;;  %v2417_v55 = vpop.f32.mrb[6].mxu1 }
 0x14d   : > { %1942 = vst [vmem:[%s3033_s6 + $0x8] sm:$0xff] %v1932_v53  ;;  %v1931_v56 = vsel %vm1911_vm3, %v1901_v46, %v1921_v51  ;;  %v1903_v57 = vadd.f32 %v2494_v52, %v3026_v40  ;;  %v2482_v58 = vpop.f32.mrb[4].mxu0  ;;  %v1178_v59 = vpop.f32.mrb[7].mxu1 }
 0x14e   : > { %1941 = vst [vmem:[%s3033_s6] sm:$0xff] %v1931_v56  ;;  %vm1914_vm4 = vcmp.ge.f32.partialorder %v1904_v54, 0.0  ;;  %v1924_v60 = vmul.f32 0.2, %v1904_v54  ;;  %v2495_v61 = vadd.f32 %v2482_v58, %v2397_v38  ;;  %v1856_v62 = vpop.f32.mrb[5].mxu0 }
 0x14f   : > { %vm1913_vm5 = vcmp.ge.f32.partialorder %v1903_v57, 0.0  ;;  %v1923_v63 = vmul.f32 0.2, %v1903_v57  ;;  %v2496_v1 = vadd.f32 %v1856_v62, %v996_v39 }
 0x150   : > { %v1934_v2 = vsel %vm1914_vm4, %v1904_v54, %v1924_v60  ;;  %v1906_v3 = vadd.f32 %v2495_v61, %v3026_v40  ;;  %v2420_v4 = vpop.f32.mrb[8].mxu1 }
 0x151   : > { %1944 = vst [vmem:[%s3033_s6 + $0x18] sm:$0xff] %v1934_v2  ;;  %v1933_v5 = vsel %vm1913_vm5, %v1903_v57, %v1923_v63  ;;  %v1905_v6 = vadd.f32 %v2496_v1, %v3026_v40  ;;  %v2485_v7 = vpop.f32.mrb[6].mxu0  ;;  %v1188_v8 = vpop.f32.mrb[9].mxu1 }
 0x152   : > { %1943 = vst [vmem:[%s3033_s6 + $0x10] sm:$0xff] %v1933_v5  ;;  %vm1916_vm6 = vcmp.ge.f32.partialorder %v1906_v3, 0.0  ;;  %v1926_v9 = vmul.f32 0.2, %v1906_v3  ;;  %v2497_v10 = vadd.f32 %v2485_v7, %v2417_v55  ;;  %v1866_v11 = vpop.f32.mrb[7].mxu0 }
 0x153   : > { %vm1915_vm7 = vcmp.ge.f32.partialorder %v1905_v6, 0.0  ;;  %v1925_v12 = vmul.f32 0.2, %v1905_v6  ;;  %v2498_v13 = vadd.f32 %v1866_v11, %v1178_v59 }
 0x154   : > { %v1936_v14 = vsel %vm1916_vm6, %v1906_v3, %v1926_v9  ;;  %v1908_v15 = vadd.f32 %v2497_v10, %v3026_v40 }
 0x155   : > { %1946 = vst [vmem:[%s3033_s6 + $0x28] sm:$0xff] %v1936_v14  ;;  %v1935_v16 = vsel %vm1915_vm7, %v1905_v6, %v1925_v12  ;;  %v1907_v17 = vadd.f32 %v2498_v13, %v3026_v40  ;;  %v2488_v18 = vpop.f32.mrb[8].mxu0 }
 0x156   : > { %1945 = vst [vmem:[%s3033_s6 + $0x20] sm:$0xff] %v1935_v16  ;;  %vm1918_vm8 = vcmp.ge.f32.partialorder %v1908_v15, 0.0  ;;  %v1928_v19 = vmul.f32 0.2, %v1908_v15  ;;  %v2499_v0 = vadd.f32 %v2488_v18, %v2420_v4  ;;  %v1876_v20 = vpop.f32.mrb[9].mxu0 }
 0x157   : > { %vm1917_vm9 = vcmp.ge.f32.partialorder %v1907_v17, 0.0  ;;  %v1927_v21 = vmul.f32 0.2, %v1907_v17  ;;  %v2500_v22 = vadd.f32 %v1876_v20, %v1188_v8 }
 0x158   : > { %v1938_v23 = vsel %vm1918_vm8, %v1908_v15, %v1928_v19  ;;  %v1910_v24 = vadd.f32 %v2499_v0, %v3026_v40 }
 0x159   : > { %1948 = vst [vmem:[%s3033_s6 + $0x38] sm:$0xff] %v1938_v23  ;;  %v1937_v25 = vsel %vm1917_vm9, %v1907_v17, %v1927_v21  ;;  %v1909_v26 = vadd.f32 %v2500_v22, %v3026_v40 }
 0x15a   : > { %1947 = vst [vmem:[%s3033_s6 + $0x30] sm:$0xff] %v1937_v25  ;;  %vm1920_vm10 = vcmp.ge.f32.partialorder %v1910_v24, 0.0  ;;  %v1930_v27 = vmul.f32 0.2, %v1910_v24 }
 0x15b   : > { %vm1919_vm11 = vcmp.ge.f32.partialorder %v1909_v26, 0.0  ;;  %v1929_v28 = vmul.f32 0.2, %v1909_v26 }
 0x15c   : > { %v1940_v29 = vsel %vm1920_vm10, %v1910_v24, %v1930_v27 }
 0x15d   : > { %1950 = vst [vmem:[%s3033_s6 + $0x48] sm:$0xff] %v1940_v29  ;;  %v1939_v30 = vsel %vm1919_vm11, %v1909_v26, %v1929_v28 }
 0x15e   : > { %1949 = vst [vmem:[%s3033_s6 + $0x40] sm:$0xff] %v1939_v30 }
 0x15f   : > { %2660 = shalt.err (!%p2657_p9)
}
 0x160   : > { %s2661_s24 = scalar_lea.hbm %s3056_s13, 1280  ;;  %s2665_s8 = scalar_lea.hbm %s3120_s4, 10240 }
 0x161   : > { %p2662_p10 = scmp.ne.s32.totalorder %s3056_s13, %s2661_s24  ;;  %p2666_p13 = scmp.lt.u32.totalorder %s3056_s13, %s3120_s4 }
 0x162   : > { %p2667_p0 = scmp.lt.u32.totalorder %s2665_s8, %s2661_s24  ;;  %p2669_p2 = scmp.lt.u32.totalorder %s2661_s24, %s3056_s13 }
 0x163   : > { %p2663_p11 = pnand %p2662_p10, %p2822_p3 }
 0x164   : > { %p2668_p1 = por %p2667_p0, %p2666_p13 }
 0x165   : > { %p2664_p12 = pneg %p2663_p11 }
 0x166   : > { %p2670_p4 = por %p2669_p2, %p2668_p1 }
 0x168   : > { %p2671_p5 = pnand %p2670_p4, %p2664_p12 }
 0x16a   : > { %2674 = shalt.err (!%p2671_p5)
}
 0x16b   : > { %s2744_s12 = smov 128   ;;  %s2745_s11 = smov 8  }
 0x16c   : > { %2574 = dma.vmem_to_hbm [thread:$0]  (%p2822_p3), %s3058_s10, 1280, %s3056_s13, %s3064_s14, %s2744_s12, %s2744_s12, %s2745_s11  }
 0x16d PF: > { %p2580_p6 = scmp.ge.s32.totalorder %s2741_s22, 2  ;;  %s1983_s18 = sand.u32 1, %s2713_s15  }
 0x16e   : > { %s1984_s23 = scalar_lea.sflag [#allocation4], %s1983_s18 }
 0x16f   : > { %p2577_p7 = pnand %p2580_p6, %p2831_p8 }
 0x171   : > { %2708 = dma.done.wait (!%p2577_p7), %s1984_s23, 1280  }
 0x172   : > { %2710 = vsyncadd (!%p2577_p7), %s1984_s23, 4294966016  ;;  %s17_s22 = sadd.s32 1, %s2741_s22   ;;  %s3123_s15 = smov %s2717_s16 }
 0x173   : > { %p14_p9 = scmp.ge.s32.totalorder %s17_s22, 10   ;;  %s3124_s16 = smov %s2721_s17 }
 0x174   : > { %s3125_s17 = smov %s2840_s7  ;;  %s3126_s18 = smov %s2733_s20 }
 0x175   : > { %s3127_s19 = smov %s2737_s21  ;;  %s3128_s20 = smov %s3131_s25 }
 0x176   : > { %s3129_s21 = smov %s3135_s26  ;;  %16 = sbr.rel (!%p14_p9) target bundleno = 5 (0x5), region = 96 }
 0x17d   :  { %1989 = vsyncpa [#allocation4], 1 }
 0x17e   :  { %1991 = vsyncpa [#allocation4 + $0x1], 1 }

</bundles_post_ra>
